<compile_context>
chip_gen: v7x
topology: tpu7x:2x2x1
jax: 0.10.0
libtpu: 0.0.40
codegen_flags: <defaults>
</compile_context>

<pallas_src>
import jax
import jax.numpy as jnp
from jax.experimental import pallas as pl
from jax.experimental.pallas import tpu as pltpu

# The reference module uses globals FEATURE_SIZE and N_ODOR_CLASSES.
FEATURE_SIZE = 32
N_ODOR_CLASSES = 10
SKILL_SIZE = 50
DECISION_SIZE = 20

# Zero-padded intermediate widths (identity math, cleaner bf16 tiles).
SKILL_PAD = 64
DECISION_PAD = 32

MAX_BATCH_TILE = 1024     # batch tile size for the gridded path (multiple of 16)


def _round_up(n, m):
    return ((n + m - 1) // m) * m


def _mlp_kernel(x_ref, w1_ref, b1_ref, w2_ref, b2_ref, w3_ref, b3_ref, o_ref):
    """relu(x@W1+b1) -> relu(.@W2+b2) -> .@W3+b3, bf16 MXU inputs / f32 accumulate."""
    x = x_ref[...].astype(jnp.bfloat16)                    # cast in-kernel (VPU)

    s = jnp.dot(x, w1_ref[...], preferred_element_type=jnp.float32) + b1_ref[...]
    s = jnp.maximum(s, 0.0).astype(jnp.bfloat16)           # epilogue in f32, cast for MXU

    d = jnp.dot(s, w2_ref[...], preferred_element_type=jnp.float32) + b2_ref[...]
    d = jnp.maximum(d, 0.0).astype(jnp.bfloat16)

    y = jnp.dot(d, w3_ref[...], preferred_element_type=jnp.float32) + b3_ref[...]
    o_ref[...] = y.astype(o_ref.dtype)                     # (tb, N_ODOR_CLASSES) store


def _prep_params(params):
    """Pad intermediate widths with zeros (identity math) and cast weights to bf16."""
    w1, b1, w2, b2, w3, b3 = params
    w1p = jnp.pad(w1, ((0, 0), (0, SKILL_PAD - SKILL_SIZE))).astype(jnp.bfloat16)
    b1p = jnp.pad(b1, ((0, 0), (0, SKILL_PAD - SKILL_SIZE)))
    w2p = jnp.pad(w2, ((0, SKILL_PAD - SKILL_SIZE),
                       (0, DECISION_PAD - DECISION_SIZE))).astype(jnp.bfloat16)
    b2p = jnp.pad(b2, ((0, 0), (0, DECISION_PAD - DECISION_SIZE)))
    w3p = jnp.pad(w3, ((0, DECISION_PAD - DECISION_SIZE), (0, 0))).astype(jnp.bfloat16)
    return w1p, b1p, w2p, b2p, w3p, b3


@jax.jit
def no_context_forward(x, params):
    """x: (batch, FEATURE_SIZE) float32. Returns logits (batch, N_ODOR_CLASSES) float32."""
    batch = x.shape[0]
    w1p, b1p, w2p, b2p, w3p, b3 = _prep_params(params)
    args = (x, w1p, b1p, w2p, b2p, w3p, b3)

    out_shape = jax.ShapeDtypeStruct((batch, N_ODOR_CLASSES), jnp.float32)

    weight_bytes = 2 * (FEATURE_SIZE * SKILL_PAD + SKILL_PAD * DECISION_PAD
                        + DECISION_PAD * N_ODOR_CLASSES)
    cost = pl.CostEstimate(
        flops=2 * batch * (FEATURE_SIZE * SKILL_PAD + SKILL_PAD * DECISION_PAD
                           + DECISION_PAD * N_ODOR_CLASSES),
        transcendentals=0,
        bytes_accessed=batch * (FEATURE_SIZE * 4 + N_ODOR_CLASSES * 4) + weight_bytes,
    )

    if batch <= MAX_BATCH_TILE:
        # Single tile: skip the grid machinery entirely; every operand is one
        # whole-array DMA into VMEM, no per-step pipeline overhead, no padding.
        return pl.pallas_call(
            _mlp_kernel,
            out_shape=out_shape,
            in_specs=[pl.BlockSpec(memory_space=pltpu.MemorySpace.VMEM)] * 7,
            out_specs=pl.BlockSpec(memory_space=pltpu.MemorySpace.VMEM),
            cost_estimate=cost,
        )(*args)

    # Gridded path: balance block sizes so all grid steps (and both v7x
    # TensorCores) get near-equal work; last partial block is masked by Pallas.
    n_target = pl.cdiv(batch, MAX_BATCH_TILE)              # >= 2 here
    tb = _round_up(pl.cdiv(batch, n_target), 16)           # multiple of 16 (bf16 sublanes)
    grid = (pl.cdiv(batch, tb),)

    return pl.pallas_call(
        _mlp_kernel,
        out_shape=out_shape,
        grid=grid,
        in_specs=[
            pl.BlockSpec((tb, FEATURE_SIZE), lambda i: (i, 0)),
            pl.BlockSpec((FEATURE_SIZE, SKILL_PAD), lambda i: (0, 0)),
            pl.BlockSpec((1, SKILL_PAD), lambda i: (0, 0)),
            pl.BlockSpec((SKILL_PAD, DECISION_PAD), lambda i: (0, 0)),
            pl.BlockSpec((1, DECISION_PAD), lambda i: (0, 0)),
            pl.BlockSpec((DECISION_PAD, N_ODOR_CLASSES), lambda i: (0, 0)),
            pl.BlockSpec((1, N_ODOR_CLASSES), lambda i: (0, 0)),
        ],
        out_specs=pl.BlockSpec((tb, N_ODOR_CLASSES), lambda i: (i, 0)),
        compiler_params=pltpu.CompilerParams(dimension_semantics=("parallel",)),
        cost_estimate=cost,
    )(*args)


def init_params(key):
    """PyTorch-Linear-style init (uniform +-1/sqrt(fan_in)).

    Weights are stored pre-transposed: (in_features, out_features); biases (1, out).
    """
    def linear(key, fan_in, fan_out):
        kw, kb = jax.random.split(key)
        bound = 1.0 / jnp.sqrt(float(fan_in))
        w = jax.random.uniform(kw, (fan_in, fan_out), jnp.float32, -bound, bound)
        b = jax.random.uniform(kb, (1, fan_out), jnp.float32, -bound, bound)
        return w, b

    k1, k2, k3 = jax.random.split(key, 3)
    w1, b1 = linear(k1, FEATURE_SIZE, SKILL_SIZE)
    w2, b2 = linear(k2, SKILL_SIZE, DECISION_SIZE)
    w3, b3 = linear(k3, DECISION_SIZE, N_ODOR_CLASSES)
    return (w1, b1, w2, b2, w3, b3)


def reference_forward(x, params):
    """Pure-JAX reference with identical bf16-input / f32-accumulate math."""
    w1, b1, w2, b2, w3, b3 = params
    xb = x.astype(jnp.bfloat16)
    s = jnp.maximum(
        jnp.dot(xb, w1.astype(jnp.bfloat16), preferred_element_type=jnp.float32) + b1, 0.0)
    d = jnp.maximum(
        jnp.dot(s.astype(jnp.bfloat16), w2.astype(jnp.bfloat16),
                preferred_element_type=jnp.float32) + b2, 0.0)
    return jnp.dot(d.astype(jnp.bfloat16), w3.astype(jnp.bfloat16),
                   preferred_element_type=jnp.float32) + b3


if __name__ == "__main__":
    key = jax.random.PRNGKey(0)
    kx, kx2, kx3, kp = jax.random.split(key, 4)
    params = init_params(kp)

    # Small batch -> single-block (no-grid) path.
    batch = 8
    x = jax.random.normal(kx, (batch, FEATURE_SIZE), jnp.float32)
    out = jax.block_until_ready(no_context_forward(x, params))
    ref = reference_forward(x, params)
    assert out.shape == (batch, N_ODOR_CLASSES)
    assert jnp.allclose(out, ref, atol=1e-3, rtol=1e-3), "mismatch vs reference (small batch)"

    # Mid batch, non-aligned -> still single-block path (no padding needed).
    batch2 = 300
    x2 = jax.random.normal(kx2, (batch2, FEATURE_SIZE), jnp.float32)
    out2 = jax.block_until_ready(no_context_forward(x2, params))
    ref2 = reference_forward(x2, params)
    assert out2.shape == (batch2, N_ODOR_CLASSES)
    assert jnp.allclose(out2, ref2, atol=1e-3, rtol=1e-3), "mismatch vs reference (mid batch)"

    # Large non-tile-aligned batch -> gridded parallel path with masked edge block.
    batch3 = 2500
    x3 = jax.random.normal(kx3, (batch3, FEATURE_SIZE), jnp.float32)
    out3 = jax.block_until_ready(no_context_forward(x3, params))
    ref3 = reference_forward(x3, params)
    assert out3.shape == (batch3, N_ODOR_CLASSES)
    assert jnp.allclose(out3, ref3, atol=1e-3, rtol=1e-3), "mismatch vs reference (gridded batch)"

    print("KERNEL_OK")
</pallas_src>

<mosaic_0001>
module attributes {stable_mosaic.version = 11 : i64} {
  func.func @_mlp_kernel(%arg0: memref<8x32xf32, #tpu.memory_space<vmem>>, %arg1: memref<32x64xbf16, #tpu.memory_space<vmem>>, %arg2: memref<1x64xf32, #tpu.memory_space<vmem>>, %arg3: memref<64x32xbf16, #tpu.memory_space<vmem>>, %arg4: memref<1x32xf32, #tpu.memory_space<vmem>>, %arg5: memref<32x10xbf16, #tpu.memory_space<vmem>>, %arg6: memref<1x10xf32, #tpu.memory_space<vmem>>, %arg7: memref<8x10xf32, #tpu.memory_space<vmem>>) attributes {dimension_semantics = [], scalar_prefetch = 0 : i64, scratch_operands = 0 : i64, tpu.core_type = #tpu.core_type<tc>} {
    %c0 = arith.constant 0 : index
    %c0_0 = arith.constant 0 : index
    %0 = vector.load %arg0[%c0, %c0_0] : memref<8x32xf32, #tpu.memory_space<vmem>>, vector<8x32xf32>
    %1 = arith.truncf %0 : vector<8x32xf32> to vector<8x32xbf16>
    %c0_1 = arith.constant 0 : index
    %c0_2 = arith.constant 0 : index
    %2 = vector.load %arg1[%c0_1, %c0_2] : memref<32x64xbf16, #tpu.memory_space<vmem>>, vector<32x64xbf16>
    %cst = arith.constant dense<0.000000e+00> : vector<8x64xf32>
    %3 = tpu.matmul %1, %2, %cst {dimension_numbers = #tpu.dot_dimension_numbers<[1], [0], [0], [1], [0, 0, 1, 1], [], []>} : vector<8x32xbf16>, vector<32x64xbf16>, vector<8x64xf32> -> vector<8x64xf32>
    %c0_3 = arith.constant 0 : index
    %c0_4 = arith.constant 0 : index
    %4 = vector.load %arg2[%c0_3, %c0_4] : memref<1x64xf32, #tpu.memory_space<vmem>>, vector<1x64xf32>
    %5 = vector.broadcast %4 : vector<1x64xf32> to vector<8x64xf32>
    %6 = arith.addf %3, %5 : vector<8x64xf32>
    %cst_5 = arith.constant 0.000000e+00 : f32
    %7 = vector.broadcast %cst_5 : f32 to vector<8x64xf32>
    %8 = arith.maximumf %6, %7 : vector<8x64xf32>
    %9 = arith.truncf %8 : vector<8x64xf32> to vector<8x64xbf16>
    %c0_6 = arith.constant 0 : index
    %c0_7 = arith.constant 0 : index
    %10 = vector.load %arg3[%c0_6, %c0_7] : memref<64x32xbf16, #tpu.memory_space<vmem>>, vector<64x32xbf16>
    %cst_8 = arith.constant dense<0.000000e+00> : vector<8x32xf32>
    %11 = tpu.matmul %9, %10, %cst_8 {dimension_numbers = #tpu.dot_dimension_numbers<[1], [0], [0], [1], [0, 0, 1, 1], [], []>} : vector<8x64xbf16>, vector<64x32xbf16>, vector<8x32xf32> -> vector<8x32xf32>
    %c0_9 = arith.constant 0 : index
    %c0_10 = arith.constant 0 : index
    %12 = vector.load %arg4[%c0_9, %c0_10] : memref<1x32xf32, #tpu.memory_space<vmem>>, vector<1x32xf32>
    %13 = vector.broadcast %12 : vector<1x32xf32> to vector<8x32xf32>
    %14 = arith.addf %11, %13 : vector<8x32xf32>
    %cst_11 = arith.constant 0.000000e+00 : f32
    %15 = vector.broadcast %cst_11 : f32 to vector<8x32xf32>
    %16 = arith.maximumf %14, %15 : vector<8x32xf32>
    %17 = arith.truncf %16 : vector<8x32xf32> to vector<8x32xbf16>
    %c0_12 = arith.constant 0 : index
    %c0_13 = arith.constant 0 : index
    %18 = vector.load %arg5[%c0_12, %c0_13] : memref<32x10xbf16, #tpu.memory_space<vmem>>, vector<32x10xbf16>
    %cst_14 = arith.constant dense<0.000000e+00> : vector<8x10xf32>
    %19 = tpu.matmul %17, %18, %cst_14 {dimension_numbers = #tpu.dot_dimension_numbers<[1], [0], [0], [1], [0, 0, 1, 1], [], []>} : vector<8x32xbf16>, vector<32x10xbf16>, vector<8x10xf32> -> vector<8x10xf32>
    %c0_15 = arith.constant 0 : index
    %c0_16 = arith.constant 0 : index
    %20 = vector.load %arg6[%c0_15, %c0_16] : memref<1x10xf32, #tpu.memory_space<vmem>>, vector<1x10xf32>
    %21 = vector.broadcast %20 : vector<1x10xf32> to vector<8x10xf32>
    %22 = arith.addf %19, %21 : vector<8x10xf32>
    %c0_17 = arith.constant 0 : index
    %c0_18 = arith.constant 0 : index
    %23 = vector.load %arg7[%c0_17, %c0_18] : memref<8x10xf32, #tpu.memory_space<vmem>>, vector<8x10xf32>
    tpu.vector_store %arg7[%c0_17, %c0_18], %22 {strides = array<i32>} : memref<8x10xf32, #tpu.memory_space<vmem>>, vector<8x10xf32>,
    return
  }
}

</mosaic_0001>

<bundles_post_ra>
// kernel: no_context_forward.1
= control target key start
LH: loop header
LB: loop body
LE: loop exit
PB: predicated region body
PF: predicated region fallthrough
CT: control target
= control target key end

     0   :  { %v354_v1 = vmov 0.0   ;;  %vm355_vm0 = vmmov 0   ;;  %vm53_vm1 = vcmask 261120   ;;  %s450_s0 = inlined_call_operand.vmem [shape: f32[8,32], index: 0, kind: input, shape index: {}]   ;;  %s451_s1 = inlined_call_operand.vmem [shape: bf16[32,64], index: 1, kind: input, shape index: {}]   ;;  %s452_s2 = inlined_call_operand.vmem [shape: f32[1,64], index: 2, kind: input, shape index: {}]   ;;  %s453_s3 = inlined_call_operand.vmem [shape: bf16[64,32], index: 3, kind: input, shape index: {}]   ;;  %s454_s4 = inlined_call_operand.vmem [shape: f32[1,32], index: 4, kind: input, shape index: {}]   ;;  %s455_s5 = inlined_call_operand.vmem [shape: bf16[32,10], index: 5, kind: input, shape index: {}]   ;;  %s456_s6 = inlined_call_operand.vmem [shape: f32[1,10], index: 6, kind: input, shape index: {}]   ;;  %s457_s7 = inlined_call_operand.hbm [shape: f32[8,10], index: 7, kind: output, shape index: {}]  }
   0x1   :  { %v322_v0 = vld [vmem:[%s451_s1] sm:$0xff]   ;;  %291 = vmatprep.subr.bf16.mxu0 %v354_v1  ;;  %v323_v2 = vld [vmem:[%s451_s1 + $0x8] sm:$0xff]   ;;  %299 = vmatprep.subr.bf16.mxu1 %v354_v1 }
   0x2   :  { %292 = vmatpush3.bf16.msra.mxu0 %v322_v0  ;;  %295 = vmatprep.mubr.msk.bf16.mxu0 %vm355_vm0, %v354_v1  ;;  %v28_v3 = vld [vmem:[%s450_s0] sm:$0xff]  ;;  %v325_v5 = vld [vmem:[%s453_s3 + $0x8] sm:$0xff]  }
   0x3   :  { %293 = vmatprep.subr.bf16.mxu0 %v354_v1  ;;  %v324_v4 = vld [vmem:[%s453_s3] sm:$0xff]   ;;  %307 = vmatprep.mubr.msk.bf16.mxu1 %vm355_vm0, %v354_v1  ;;  %v29_v6 = vpack.c.bf16 %v28_v3, %v28_v3 }
   0x4   :  { %300 = vmatpush3.bf16.msra.mxu1 %v324_v4 }
   0x5   :  { %301 = vmatprep.subr.bf16.mxu1 %v354_v1 }
   0x6   :  { %294 = vmatpush3.bf16.msra.mxu0 %v323_v2 }
   0x7   :  { %311 = vmatprep.subr.bf16.mxu0 %v354_v1 }
   0x8   :  { %12 = vsyncpa [#allocation3], 0  ;;  %302 = vmatpush3.bf16.msra.mxu1 %v325_v5  ;;  %v326_v7 = vld [vmem:[%s453_s3 + $0x10] sm:$0xff]   ;;  %v327_v8 = vld [vmem:[%s453_s3 + $0x18] sm:$0xff]   ;;  %vm138_vm2 = vcmask 523264   ;;  %s356_s21 = smov [#allocation2]  }
   0x9   :  { %296 = vmatmul.mubr.msk.bf16.vlgmr.msra.gmra.mrb[0].mxu0 %vm53_vm1, %v29_v6  ;;  %303 = vmatprep.subr.bf16.mxu1 %v354_v1  ;;  %v328_v9 = vld [vmem:[%s455_s5] sm:$0xff]   ;;  %v329_v18 = vld [vmem:[%s455_s5 + $0x8] sm:$0xff]   ;;  %s258_s5 = sshll.u32 %s356_s21, 4  ;;  %vm250_vm3 = vcmask 80896   ;;  %s259_s5 = int_to_ptr.vmem [resolvable:$true] %s258_s5 }
   0xa   :  { %315 = vmatprep.mubr.msk.bf16.mxu0 %vm355_vm0, %v354_v1  ;;  %312 = vmatpush3.bf16.msra.mxu0 %v328_v9  ;;  %v266_v10 = vld [vmem:[%s452_s2] ss:$0 sm:$0xff]  ;;  %p335_p1 = scmp.lt.s32.totalorder %s259_s5, %s259_s5 }
   0xb   :  { %313 = vmatprep.subr.bf16.mxu0 %v354_v1  ;;  %v270_v19 = vld [vmem:[%s454_s4] ss:$0 sm:$0xff]  ;;  %s330_s4 = scalar_lea.vmem %s259_s5, 128 }
   0xc   :  { %304 = vmatpush3.bf16.msra.mxu1 %v326_v7  ;;  %v276_v27 = vld [vmem:[%s456_s6] ss:$0 sm:$0xff]  ;;  %p331_p0 = scmp.ne.s32.totalorder %s259_s5, %s330_s4  ;;  %p336_p2 = scmp.lt.s32.totalorder %s330_s4, %s330_s4 }
   0xd   :  { %305 = vmatprep.subr.bf16.mxu1 %v354_v1 }
   0xe   :  { %314 = vmatpush3.bf16.msra.mxu0 %v329_v18  ;;  %p337_p3 = por %p336_p2, %p335_p1 }
  0x10   :  { %306 = vmatpush3.bf16.msra.mxu1 %v327_v8  ;;  %p338_p4 = pnand %p337_p3, %p331_p0 }
  0xdc   :  { %v91_v11 = vpop.f32.mrb[0].mxu0 }
  0xdd   :  { %v92_v12 = vadd.f32 %v266_v10, %v91_v11  ;;  %v297_v13 = vpop.f32.mrb[1].mxu0 }
  0xde   :  { %v94_v14 = vpop.f32.mrb[2].mxu0 }
  0xdf   :  { %v97_v15 = vmax.f32 %v92_v12, 0.0  ;;  %v298_v16 = vpop.f32.mrb[3].mxu0 }
  0xe1   :  { %v98_v17 = vpack.c.bf16 %v97_v15, %v97_v15 }
  0xe3   :  { %308 = vmatmul.mubr.msk.bf16.vlgmr.msra.gmra.mrb[0].mxu1 %vm138_vm2, %v98_v17 }
 0x1b6   :  { %v176_v20 = vpop.f32.mrb[0].mxu1 }
 0x1b7   :  { %v177_v21 = vadd.f32 %v270_v19, %v176_v20  ;;  %v309_v22 = vpop.f32.mrb[1].mxu1 }
 0x1b8   :  { %v179_v23 = vpop.f32.mrb[2].mxu1 }
 0x1b9   :  { %v182_v24 = vmax.f32 %v177_v21, 0.0  ;;  %v310_v25 = vpop.f32.mrb[3].mxu1 }
 0x1bb   :  { %v183_v26 = vpack.c.bf16 %v182_v24, %v182_v24 }
 0x1bd   :  { %316 = vmatmul.mubr.msk.bf16.vlgmr.msra.gmra.mrb[4].mxu0 %vm53_vm1, %v183_v26 }
 0x290   :  { %v244_v28 = vpop.f32.mrb[4].mxu0 }
 0x291   :  { %v245_v29 = vadd.f32 %v276_v27, %v244_v28  ;;  %v317_v30 = vpop.f32.mrb[5].mxu0 }
 0x292   :  { %v247_v31 = vpop.f32.mrb[6].mxu0 }
 0x293   :  { %v318_v32 = vpop.f32.mrb[7].mxu0  ;;  %251 = vst.msk [vmem:[#allocation2] sm:$0xff] %vm250_vm3, %v245_v29 }
 0x294   :  { %341 = shalt.err (!%p338_p4)
}
 0x295   :  { %s342_s6 = scalar_lea.hbm %s457_s7, 128 }
 0x296   :  { %p343_p5 = scmp.ne.s32.totalorder %s457_s7, %s342_s6  ;;  %p346_p6 = scmp.lt.u32.totalorder %s342_s6, %s457_s7 }
 0x298   :  { %p348_p7 = pnand %p346_p6, %p343_p5 }
 0x29a   :  { %351 = shalt.err (!%p348_p7)
}
 0x29b   :  { %261 = dma.vmem_to_hbm [thread:$0]  %s259_s5, 128, %s457_s7, [#allocation3]  }
 0x29c   :  { %352 = dma.done.wait [#allocation3], 128  }
 0x29d   :  { %353 = vsyncadd [#allocation3], 4294967168 }
 0x29e   :  { %265 = vsyncpa [#allocation3], 1 }

</bundles_post_ra>
